<compile_context>
chip_gen: v5e
topology: v5e:2x2
jax: 0.10.0
libtpu: 0.0.40
codegen_flags: <defaults>
</compile_context>

<pallas_src>
import functools

import jax
import jax.numpy as jnp
from jax.experimental import pallas as pl
from jax.experimental.pallas import tpu as pltpu


# --------------------------------------------------------------------------
# Fused single-pass kernel: one (C, HW) image slab per grid step.
# --------------------------------------------------------------------------

def _fused_kernel(x_ref, w1t_ref, b1_ref, w2_ref, b2_ref, o_ref, *, inv_hw):
    x = x_ref[0]                                                  # (C, HW)
    # AdaptiveAvgPool2d(1): per-channel spatial mean, accumulated in f32.
    pooled = jnp.sum(x.astype(jnp.float32), axis=-1, keepdims=True) * inv_hw  # (C, 1)

    # Tiny squeeze/excite MLP done with broadcasts + axis reductions only
    # (no matmul, no transposes — safest lowering for tiny C / C_r).
    #   hid[r] = relu(sum_c W1[r, c] * pooled[c] + b1[r])  -> row (1, C_r)
    hid = jnp.maximum(
        jnp.sum(w1t_ref[...] * pooled, axis=0, keepdims=True) + b1_ref[...],
        0.0)                                                      # (1, C_r)
    #   att[c] = sigmoid(sum_r W2[c, r] * hid[r] + b2[c])   -> col (C, 1)
    z = jnp.sum(w2_ref[...] * hid, axis=1, keepdims=True) + b2_ref[...]
    att = 1.0 / (1.0 + jnp.exp(-z))                               # (C, 1)

    # Cast att to x.dtype first (reference / PyTorch semantics), then scale.
    o_ref[0] = x * att.astype(x.dtype)


# --------------------------------------------------------------------------
# Two-pass fallback, pass 1: spatial mean (AdaptiveAvgPool2d(1)).
# --------------------------------------------------------------------------

def _pool_kernel(x_ref, mean_ref, *, hw, hw_tile):
    j = pl.program_id(1)
    nj = pl.num_programs(1)

    @pl.when(j == 0)
    def _():
        mean_ref[...] = jnp.zeros_like(mean_ref)

    if hw % hw_tile != 0:
        # Ragged HW edge: mask only on the last j tile (hot path stays clean).
        @pl.when(j < nj - 1)
        def _():
            mean_ref[...] += jnp.sum(
                x_ref[...].astype(jnp.float32), axis=-1, keepdims=True)

        @pl.when(j == nj - 1)
        def _():
            xe = x_ref[...].astype(jnp.float32)
            col = j * hw_tile + jax.lax.broadcasted_iota(jnp.int32, xe.shape, 1)
            xe = jnp.where(col < hw, xe, 0.0)
            mean_ref[...] += jnp.sum(xe, axis=-1, keepdims=True)
    else:
        mean_ref[...] += jnp.sum(
            x_ref[...].astype(jnp.float32), axis=-1, keepdims=True)

    @pl.when(j == nj - 1)
    def _():
        mean_ref[...] = mean_ref[...] * (1.0 / hw)                # sum -> mean


# --------------------------------------------------------------------------
# Two-pass fallback, pass 2: pure HBM-roofline elementwise scale.
# --------------------------------------------------------------------------

def _scale_kernel(x_ref, att_ref, o_ref):
    # att is pre-cast to x.dtype in the wrapper; multiply in x.dtype.
    o_ref[...] = (x_ref[...] * att_ref[...]).astype(o_ref.dtype)


# --------------------------------------------------------------------------
# Block / VMEM sizing helpers.
# --------------------------------------------------------------------------

def _vmem_capacity_bytes():
    try:
        cap = getattr(pltpu.get_tpu_info(), "vmem_capacity_bytes", None)
        if cap:
            return int(cap)
    except Exception:
        pass
    return 64 * 2**20          # conservative default (v7x per-TensorCore VMEM)


def _pick_blocks(nc, hw, itemsize, target_bytes=4 << 20):
    """Lane-dense tiles (multiple of 128 or full HW), ~4 MiB input blocks."""
    t = hw if hw <= 8192 else 8192                 # 8192 is a multiple of 128
    target_rows = max(8, target_bytes // max(1, t * itemsize))
    if nc <= 8:
        r = nc                                     # full extent: always legal
    else:
        r = min(nc, (target_rows // 8) * 8)        # multiple of 8, or full dim
    return r, t


def _megacore_rows(nc, r):
    """Keep >=2 row blocks on pass 1's only parallel axis (v7x has 2 TCs)."""
    if nc > 8 and pl.cdiv(nc, r) < 2:
        return max(8, ((nc // 2) // 8) * 8)
    return r


# --------------------------------------------------------------------------
# Public wrapper.
# --------------------------------------------------------------------------

def channel_attention(x, w1, b1, w2, b2, *, force_two_pass=False):
    """Forward of ChannelAttention for NCHW x.

    w1: (C_r, C), b1: (C_r,), w2: (C, C_r), b2: (C,)  (1x1 conv weights squeezed).
    """
    n, c, h, w = x.shape
    hw = h * w
    nc = n * c
    isz = jnp.dtype(x.dtype).itemsize
    f32 = jnp.float32
    c_r = w1.shape[0]

    # -------- fused single-pass path: per-image slab resident in VMEM -------
    slab_bytes = c * hw * isz
    # Double-buffered in + out slabs must fit with headroom (~24 MiB on v7x,
    # ~48 MiB on v5e/v6e).
    budget = min(48 * 2**20, (2 * _vmem_capacity_bytes()) // 5)
    if (not force_two_pass) and 4 * slab_bytes <= budget:
        x3d = x.reshape(n, c, hw)
        w1t = jnp.asarray(w1, f32).T                  # (C, C_r)
        b1r = jnp.asarray(b1, f32).reshape(1, -1)     # (1, C_r)
        w2f = jnp.asarray(w2, f32)                    # (C, C_r)
        b2c = jnp.asarray(b2, f32).reshape(-1, 1)     # (C, 1)

        vmem_limit = int(min(48 * 2**20,
                             max(16 * 2**20, 5 * slab_bytes + (1 << 20))))
        out3d = pl.pallas_call(
            functools.partial(_fused_kernel, inv_hw=1.0 / hw),
            out_shape=jax.ShapeDtypeStruct((n, c, hw), x.dtype),
            grid=(n,),
            in_specs=[
                pl.BlockSpec((1, c, hw), lambda i: (i, 0, 0)),   # image slab
                pl.BlockSpec((c, c_r), lambda i: (0, 0)),        # W1^T
                pl.BlockSpec((1, c_r), lambda i: (0, 0)),        # b1 (row)
                pl.BlockSpec((c, c_r), lambda i: (0, 0)),        # W2
                pl.BlockSpec((c, 1), lambda i: (0, 0)),          # b2 (col)
            ],
            out_specs=pl.BlockSpec((1, c, hw), lambda i: (i, 0, 0)),
            compiler_params=pltpu.CompilerParams(
                dimension_semantics=("parallel",),
                vmem_limit_bytes=vmem_limit),
            cost_estimate=pl.CostEstimate(
                flops=2 * nc * hw + 4 * n * c * c_r,
                transcendentals=n * c,
                bytes_accessed=2 * nc * hw * isz),
        )(x3d, w1t, b1r, w2f, b2c)
        return out3d.reshape(n, c, h, w)

    # -------- two-pass streaming fallback (slab too big for VMEM) -----------
    x2d = x.reshape(nc, hw)
    r, t = _pick_blocks(nc, hw, isz)
    r1 = _megacore_rows(nc, r)                  # pass-1 rows (megacore aware)
    vmem_limit = int(min(48 * 2**20, max(16 * 2**20, 6 * r * t * isz)))

    # pass 1: pooled means (N*C, 1) in f32; output-resident accumulator over j
    pooled = pl.pallas_call(
        functools.partial(_pool_kernel, hw=hw, hw_tile=t),
        out_shape=jax.ShapeDtypeStruct((nc, 1), jnp.float32),
        grid=(pl.cdiv(nc, r1), pl.cdiv(hw, t)),
        in_specs=[pl.BlockSpec((r1, t), lambda i, j: (i, j))],
        out_specs=pl.BlockSpec((r1, 1), lambda i, j: (i, 0)),
        compiler_params=pltpu.CompilerParams(
            dimension_semantics=("parallel", "arbitrary"),
            vmem_limit_bytes=vmem_limit),
        cost_estimate=pl.CostEstimate(
            flops=nc * hw, transcendentals=0,
            bytes_accessed=nc * hw * isz + nc * 4),
    )(x2d)

    # tiny squeeze/excite MLP on (N, C): hoisted out of the streaming kernels
    pooled_nc = pooled.reshape(n, c)
    hid = jnp.maximum(pooled_nc @ jnp.asarray(w1, f32).T + jnp.asarray(b1, f32),
                      0.0)
    att = jax.nn.sigmoid(hid @ jnp.asarray(w2, f32).T + jnp.asarray(b2, f32))
    att_col = att.reshape(nc, 1).astype(x.dtype)   # cast first, mul in x.dtype

    # pass 2: memory-bound elementwise scale
    out2d = pl.pallas_call(
        _scale_kernel,
        out_shape=jax.ShapeDtypeStruct((nc, hw), x.dtype),
        grid=(pl.cdiv(nc, r), pl.cdiv(hw, t)),
        in_specs=[
            pl.BlockSpec((r, t), lambda i, j: (i, j)),   # x tile
            pl.BlockSpec((r, 1), lambda i, j: (i, 0)),   # per-row attention
        ],
        out_specs=pl.BlockSpec((r, t), lambda i, j: (i, j)),
        compiler_params=pltpu.CompilerParams(
            dimension_semantics=("parallel", "parallel"),
            vmem_limit_bytes=vmem_limit),
        cost_estimate=pl.CostEstimate(
            flops=nc * hw, transcendentals=0,
            bytes_accessed=2 * nc * hw * isz + nc * isz),
    )(x2d, att_col)

    return out2d.reshape(n, c, h, w)


def channel_attention_ref(x, w1, b1, w2, b2):
    """Pure-JAX reference of the PyTorch forward."""
    pooled = jnp.mean(x.astype(jnp.float32), axis=(2, 3))      # (N, C)
    hid = jnp.maximum(pooled @ w1.T + b1, 0.0)                 # (N, C_r)
    att = jax.nn.sigmoid(hid @ w2.T + b2)                      # (N, C)
    return (x * att[:, :, None, None].astype(x.dtype)).astype(x.dtype)


if __name__ == "__main__":
    # Module config: num_features=4, reduction=2  -> C_r = 2
    N, C, H, W = 2, 4, 16, 16
    C_R = C // 2

    key = jax.random.PRNGKey(0)
    kx, k1, k2, k3, k4 = jax.random.split(key, 5)

    x = jax.random.normal(kx, (N, C, H, W), dtype=jnp.float32)
    w1 = jax.random.normal(k1, (C_R, C), dtype=jnp.float32) * 0.1
    b1 = jax.random.normal(k2, (C_R,), dtype=jnp.float32) * 0.1
    w2 = jax.random.normal(k3, (C, C_R), dtype=jnp.float32) * 0.1
    b2 = jax.random.normal(k4, (C,), dtype=jnp.float32) * 0.1

    # Fused single-pass path (the (C, HW) slab fits VMEM at this size).
    ref = channel_attention_ref(x, w1, b1, w2, b2)
    out = jax.block_until_ready(channel_attention(x, w1, b1, w2, b2))
    assert out.shape == (N, C, H, W)
    assert jnp.allclose(out, ref, atol=1e-5, rtol=1e-5)

    # Two-pass streaming fallback (also exercises the ragged-HW-edge mask:
    # HW = 8320 -> one full 8192-lane tile + one masked edge tile).
    H2, W2 = 40, 208
    x2 = jax.random.normal(kx, (N, C, H2, W2), dtype=jnp.float32)
    ref2 = channel_attention_ref(x2, w1, b1, w2, b2)
    out2 = jax.block_until_ready(
        channel_attention(x2, w1, b1, w2, b2, force_two_pass=True))
    assert out2.shape == (N, C, H2, W2)
    assert jnp.allclose(out2, ref2, atol=1e-5, rtol=1e-5)

    print("KERNEL_OK")
</pallas_src>

<mosaic_0001>
module attributes {stable_mosaic.version = 11 : i64} {
  func.func @_fused_kernel(%arg0: i32, %arg1: memref<1x4x256xf32, #tpu.memory_space<vmem>>, %arg2: memref<4x2xf32, #tpu.memory_space<vmem>>, %arg3: memref<1x2xf32, #tpu.memory_space<vmem>>, %arg4: memref<4x2xf32, #tpu.memory_space<vmem>>, %arg5: memref<4x1xf32, #tpu.memory_space<vmem>>, %arg6: memref<1x4x256xf32, #tpu.memory_space<vmem>>) attributes {dimension_semantics = [#tpu.dimension_semantics<parallel>], iteration_bounds = array<i64: 2>, scalar_prefetch = 0 : i64, scratch_operands = 0 : i64, tpu.core_type = #tpu.core_type<tc>, window_params = [{transform_indices = @transform_0, window_bounds = array<i64: 1, 4, 256>}, {pipeline_mode = #tpu.pipeline_mode<synchronous>, transform_indices = @transform_1, window_bounds = array<i64: 4, 2>}, {pipeline_mode = #tpu.pipeline_mode<synchronous>, transform_indices = @transform_2, window_bounds = array<i64: 1, 2>}, {pipeline_mode = #tpu.pipeline_mode<synchronous>, transform_indices = @transform_3, window_bounds = array<i64: 4, 2>}, {pipeline_mode = #tpu.pipeline_mode<synchronous>, transform_indices = @transform_4, window_bounds = array<i64: 4, 1>}, {transform_indices = @transform_5, window_bounds = array<i64: 1, 4, 256>}]} {
    %c0 = arith.constant 0 : index
    %c0_0 = arith.constant 0 : index
    %c0_1 = arith.constant 0 : index
    %0 = vector.load %arg1[%c0, %c0_0, %c0_1] : memref<1x4x256xf32, #tpu.memory_space<vmem>>, vector<1x4x256xf32>
    %1 = vector.shape_cast %0 : vector<1x4x256xf32> to vector<4x256xf32>
    %cst = arith.constant dense<0.000000e+00> : vector<4xf32>
    %2 = vector.multi_reduction <add>, %1, %cst [1] : vector<4x256xf32> to vector<4xf32>
    %3 = vector.shape_cast %2 : vector<4xf32> to vector<4x1xf32>
    %cst_2 = arith.constant 3.906250e-03 : f32
    %4 = vector.broadcast %cst_2 : f32 to vector<4x1xf32>
    %5 = arith.mulf %3, %4 : vector<4x1xf32>
    %c0_3 = arith.constant 0 : index
    %c0_4 = arith.constant 0 : index
    %6 = vector.load %arg2[%c0_3, %c0_4] : memref<4x2xf32, #tpu.memory_space<vmem>>, vector<4x2xf32>
    %7 = vector.broadcast %5 : vector<4x1xf32> to vector<4x2xf32>
    %8 = arith.mulf %6, %7 : vector<4x2xf32>
    %cst_5 = arith.constant dense<0.000000e+00> : vector<2xf32>
    %9 = vector.multi_reduction <add>, %8, %cst_5 [0] : vector<4x2xf32> to vector<2xf32>
    %10 = vector.shape_cast %9 : vector<2xf32> to vector<1x2xf32>
    %c0_6 = arith.constant 0 : index
    %c0_7 = arith.constant 0 : index
    %11 = vector.load %arg3[%c0_6, %c0_7] : memref<1x2xf32, #tpu.memory_space<vmem>>, vector<1x2xf32>
    %12 = arith.addf %10, %11 : vector<1x2xf32>
    %cst_8 = arith.constant 0.000000e+00 : f32
    %13 = vector.broadcast %cst_8 : f32 to vector<1x2xf32>
    %14 = arith.maximumf %12, %13 : vector<1x2xf32>
    %c0_9 = arith.constant 0 : index
    %c0_10 = arith.constant 0 : index
    %15 = vector.load %arg4[%c0_9, %c0_10] : memref<4x2xf32, #tpu.memory_space<vmem>>, vector<4x2xf32>
    %16 = vector.broadcast %14 : vector<1x2xf32> to vector<4x2xf32>
    %17 = arith.mulf %15, %16 : vector<4x2xf32>
    %cst_11 = arith.constant dense<0.000000e+00> : vector<4xf32>
    %18 = vector.multi_reduction <add>, %17, %cst_11 [1] : vector<4x2xf32> to vector<4xf32>
    %19 = vector.shape_cast %18 : vector<4xf32> to vector<4x1xf32>
    %c0_12 = arith.constant 0 : index
    %c0_13 = arith.constant 0 : index
    %20 = vector.load %arg5[%c0_12, %c0_13] : memref<4x1xf32, #tpu.memory_space<vmem>>, vector<4x1xf32>
    %21 = arith.addf %19, %20 : vector<4x1xf32>
    %cst_14 = arith.constant 0.000000e+00 : f32
    %22 = vector.broadcast %cst_14 : f32 to vector<4x1xf32>
    %23 = arith.subf %22, %21 : vector<4x1xf32>
    %24 = math.exp %23 : vector<4x1xf32>
    %cst_15 = arith.constant 1.000000e+00 : f32
    %25 = vector.broadcast %cst_15 : f32 to vector<4x1xf32>
    %26 = arith.addf %25, %24 : vector<4x1xf32>
    %cst_16 = arith.constant 1.000000e+00 : f32
    %27 = vector.broadcast %cst_16 : f32 to vector<4x1xf32>
    %28 = arith.divf %27, %26 : vector<4x1xf32>
    %29 = vector.broadcast %28 : vector<4x1xf32> to vector<4x256xf32>
    %30 = arith.mulf %1, %29 : vector<4x256xf32>
    %c0_17 = arith.constant 0 : index
    %c0_18 = arith.constant 0 : index
    %c0_19 = arith.constant 0 : index
    %31 = vector.load %arg6[%c0_17, %c0_18, %c0_19] : memref<1x4x256xf32, #tpu.memory_space<vmem>>, vector<1x4x256xf32>
    %32 = vector.shape_cast %31 : vector<1x4x256xf32> to vector<4x256xf32>
    %33 = vector.shape_cast %30 : vector<4x256xf32> to vector<1x4x256xf32>
    tpu.vector_store %arg6[%c0_17, %c0_18, %c0_19], %33 {strides = array<i32>} : memref<1x4x256xf32, #tpu.memory_space<vmem>>, vector<1x4x256xf32>,
    return
  }
  func.func @transform_0(%arg0: i32) -> (i32, i32, i32) {
    %c0_i32 = arith.constant 0 : i32
    %c0_i32_0 = arith.constant 0 : i32
    %c0_i32_1 = arith.constant 0 : i32
    return %arg0, %c0_i32, %c0_i32_0 : i32, i32, i32
  }
  func.func @transform_1(%arg0: i32) -> (i32, i32) {
    %c0_i32 = arith.constant 0 : i32
    %c0_i32_0 = arith.constant 0 : i32
    %c0_i32_1 = arith.constant 0 : i32
    return %c0_i32, %c0_i32_0 : i32, i32
  }
  func.func @transform_2(%arg0: i32) -> (i32, i32) {
    %c0_i32 = arith.constant 0 : i32
    %c0_i32_0 = arith.constant 0 : i32
    %c0_i32_1 = arith.constant 0 : i32
    return %c0_i32, %c0_i32_0 : i32, i32
  }
  func.func @transform_3(%arg0: i32) -> (i32, i32) {
    %c0_i32 = arith.constant 0 : i32
    %c0_i32_0 = arith.constant 0 : i32
    %c0_i32_1 = arith.constant 0 : i32
    return %c0_i32, %c0_i32_0 : i32, i32
  }
  func.func @transform_4(%arg0: i32) -> (i32, i32) {
    %c0_i32 = arith.constant 0 : i32
    %c0_i32_0 = arith.constant 0 : i32
    %c0_i32_1 = arith.constant 0 : i32
    return %c0_i32, %c0_i32_0 : i32, i32
  }
  func.func @transform_5(%arg0: i32) -> (i32, i32, i32) {
    %c0_i32 = arith.constant 0 : i32
    %c0_i32_0 = arith.constant 0 : i32
    %c0_i32_1 = arith.constant 0 : i32
    return %arg0, %c0_i32, %c0_i32_0 : i32, i32, i32
  }
}

</mosaic_0001>

<bundles_post_ra>
// kernel: tpu_custom_call.1
= control target key start
LH: loop header
LB: loop body
LE: loop exit
PB: predicated region body
PF: predicated region fallthrough
CT: control target
= control target key end

     0   :  { %10 = vsyncpa [#allocation3], 0  ;;  %s698_s0 = inlined_call_operand.vmem [shape: f32[2,4,256], index: 0, kind: input, shape index: {}]   ;;  %s699_s1 = inlined_call_operand.vmem [shape: f32[4,2], index: 1, kind: input, shape index: {}]   ;;  %s700_s2 = inlined_call_operand.hbm [shape: f32[1,2], index: 2, kind: input, shape index: {}]   ;;  %s701_s3 = inlined_call_operand.vmem [shape: f32[4,2], index: 3, kind: input, shape index: {}]   ;;  %s702_s4 = inlined_call_operand.vmem [shape: f32[4,1], index: 4, kind: input, shape index: {}]   ;;  %s703_s5 = inlined_call_operand.hbm [shape: f32[2,4,256], index: 5, kind: output, shape index: {}]  }
   0x1   :  { %11 = vsyncpa [#allocation4], 0 }
   0x2   :  { %13 = vsyncpa [#allocation4 + $0x1], 0  ;;  %s596_s18 = smov 0   ;;  %s598_s19 = smov 0  }
   0x3   :  { %s600_s20 = smov 0   ;;  %s602_s21 = smov 0  }
   0x4 LB: > { %s617_s22 = sadd.s32 4294967295, %s561_s21   ;;  %s391_s23 = sadd.s32 4294967294, %s561_s21   ;;  %s561_s21 = sphi %s602_s21, %s709_s21   ;;  %s557_s20 = sphi %s600_s20, %s708_s20   ;;  %s553_s19 = sphi %s598_s19, %s707_s19   ;;  %s549_s18 = sphi %s596_s18, %s706_s18  }
   0x5   : > { %s621_s24 = sadd.s32 1, %s561_s21   ;;  %s136_s25 = sadd.s32 1, %s557_s20 }
   0x6   : > { %s133_s26 = ssub.s32 %s561_s21, %s621_s24  ;;  %p146_p0 = scmp.ne.s32.totalorder %s557_s20, %s553_s19 }
   0x7   : > { %p134_p1 = scmp.eq.s32.totalorder %s133_s26, 0  ;;  %p147_p2 = scmp.eq.s32.totalorder %s617_s22, 1 }
   0x8   : > { %p152_p3 = scmp.ne.s32.totalorder %s553_s19, %s549_s18  ;;  %p153_p4 = scmp.eq.s32.totalorder %s391_s23, 1 }
   0x9   : > { %s632_s27 = scalar_select %p134_p1, %s557_s20, %s136_s25  }
   0xa   : > { %p634_p5 = por %p147_p2, %p146_p0  ;;  %p638_p6 = por %p153_p4, %p152_p3 }
   0xb   : > { %p392_p7 = scmp.ge.s32.totalorder %s561_s21, 1  ;;  %p160_p8 = scmp.lt.s32.totalorder %s561_s21, 3 }
   0xc   : > { %p421_p9 = scmp.eq.s32.totalorder %s617_s22, 0  ;;  %s175_s7 = sshll.u32 %s700_s2, 4  ;;  %s176_s7 = int_to_ptr.hbm [resolvable:$true] %s175_s7 }
   0xd   : > { %p161_p10 = pnand %p392_p7, %p160_p8  ;;  %s563_s8 = smov [#allocation2]  }
   0xe   : > { %s177_s9 = sshll.u32 %s563_s8, 4  ;;  %s178_s9 = int_to_ptr.vmem [resolvable:$true] %s177_s9 }
   0xf   : > { %p413_p11 = pneg %p161_p10  ;;  %204 = sbr.rel (%p161_p10) target bundleno = 451 (0x1c3), region = 40 }
  0x11   : > { %p414_p12 = pnand %p421_p9, %p413_p11 }
  0x13   : > { %416 = dma.hbm_to_vmem [thread:$0]  (!%p414_p12), %s176_s7, 16, %s178_s9, [#allocation3]  }
  0x14   : > { %540 = dma.done.wait (%p421_p9), [#allocation3], 16  }
  0x15   : > { %542 = vsyncadd (%p421_p9), [#allocation3], 4294967280  ;;  %p233_p13 = scmp.lt.s32.totalorder %s617_s22, 1  ;;  %vm245_vm0 = vcmask 1043456   ;;  %v252_v6 = vld [vmem:[%s699_s1] sm:$0xf] }
  0x16   : > { %vm254_vm1 = vcmask 11264   ;;  %v262_v16 = vld [vmem:[#allocation2] sm:$0x1]  ;;  %v265_v20 = vld [vmem:[%s701_s3] sm:$0xf]  ;;  %v564_v24 = vmov 0  }
  0x17   : > { %s234_s10 = scalar_select %p233_p13, %s617_s22, 1  ;;  %459 = vset.pattern.permute.xlu1 %v564_v24  ;;  %460 = vset.pattern.permute.xlu0 %v564_v24  ;;  %v271_v25 = vld [vmem:[%s702_s4] sm:$0xf]  ;;  %v565_v42 = vmov 839922192  }
  0x18   : > { %s230_s30 = sand.u32 1, %s553_s19   ;;  %v297_v43 = vunpack.c.l.s4 %v565_v42  ;;  %s406_s7 = sshll.u32 %s617_s22, 3 }
  0x19   : > { %s405_s11 = sshll.u32 %s234_s10, 3  ;;  %s397_s6 = sshll.u32 %s230_s30, 3 }
  0x1a   : > { %s237_s14 = scalar_lea.vmem %s698_s0, %s405_s11  ;;  %v298_v44 = vunpack.c.0.s8 %v297_v43  ;;  %s315_s10 = scalar_lea.hbm %s703_s5, %s406_s7 }
  0x1b   : > { %v653_v0 = vld [vmem:[%s237_s14] sm:$0xff]  ;;  %s232_s11 = scalar_lea.vmem [#allocation5], %s397_s6  ;;  %s319_s13 = sshll.u32 %s315_s10, 4  ;;  %s320_s13 = int_to_ptr.hbm [resolvable:$true] %s319_s13 }
  0x1c   : > { %240 = vst [vmem:[#allocation1] ss:$2 sm:$0xff] %v653_v0  ;;  %s317_s12 = sshll.u32 %s232_s11, 4  ;;  %s304_s14 = scalar_lea.sflag [#allocation4], %s230_s30  ;;  %s318_s12 = int_to_ptr.vmem [resolvable:$true] %s317_s12 }
  0x1d   : > { %s509_s15 = sshra.s32 %s320_s13, 4  ;;  %s515_s23 = scalar_lea.hbm %s703_s5, 16  ;;  %s510_s15 = int_to_ptr.hbm [resolvable:$true] %s509_s15 }
  0x1e   : > { %s511_s22 = scalar_lea.hbm %s510_s15, 8  ;;  %p516_p3 = scmp.lt.s32.totalorder %s510_s15, %s703_s5 }
  0x1f   : > { %p512_p0 = scmp.ne.s32.totalorder %s510_s15, %s511_s22  ;;  %p517_p4 = scmp.lt.s32.totalorder %s515_s23, %s511_s22 }
  0x21   : > { %p513_p1 = pnand %p512_p0, %p634_p5  ;;  %p518_p7 = por %p517_p4, %p516_p3 }
  0x23   : > { %v241_v1 = vld.sshfl [vmem:[#allocation1] sm:$0xff pattern:$0x75316420]  ;;  %v242_v2 = vld.sshfl [vmem:[#allocation1 + $0x8] sm:$0xff pattern:$0x75316420]  ;;  %p514_p2 = pneg %p513_p1 }
  0x24   : > { %v246_v3 = vsel %vm245_vm0, %v241_v1, 0.0  ;;  %v247_v4 = vsel %vm245_vm0, %v242_v2, 0.0 }
  0x25   : > { %v248_v5 = vadd.f32 %v247_v4, %v246_v3  ;;  %p519_p8 = pnand %p518_p7, %p514_p2 }
  0x27   : > { %249 = vadd.xlane.f32.xlu0 %v248_v5 }
  0x9a   : > { %v250_v7 = vpop.xlane.xlu0 %249 }
  0x9b   : > { %v251_v8 = vmul.f32 0.00390625, %v250_v7 }
  0x9d   : > { %v253_v9 = vmul.f32 %v252_v6, %v251_v8 }
  0x9f   : > { %v255_v10 = vsel %vm254_vm1, %v253_v9, 0.0 }
  0xa0   : > { %v256_v11 = vrot.slane %v255_v10, 4 }
  0xa2   : > { %v257_v12 = vadd.f32 %v256_v11, %v255_v10 }
  0xa4   : > { %v258_v13 = vrot.slane %v257_v12, 2 }
  0xa6   : > { %v259_v14 = vadd.f32 %v258_v13, %v257_v12 }
  0xa8   : > { %v260_v15 = vrot.slane %v259_v14, 1 }
  0xaa   : > { %v261_v17 = vadd.f32 %v260_v15, %v259_v14 }
  0xac   : > { %v263_v18 = vadd.f32 %v262_v16, %v261_v17 }
  0xae   : > { %v264_v19 = vmax.f32 %v263_v18, 0.0 }
  0xb0   : > { %v266_v21 = vperm.slane %v264_v19, 0 }
  0xb2   : > { %v267_v22 = vmul.f32 %v266_v21, %v265_v20 }
  0xb4   : > { %v268_v23 = vsel %vm254_vm1, %v267_v22, 0.0 }
  0xb5   : > { %269 = vadd.xlane.f32.xlu0 %v268_v23 }
 0x128   : > { %v270_v26 = vpop.xlane.xlu0 %269 }
 0x129   : > { %v272_v27 = vadd.f32 %v271_v25, %v270_v26 }
 0x12b   : > { %v273_v28 = vsub.f32 0.0, %v272_v27 }
 0x12d   : > { %v274_v29 = vmul.f32 1.442695, %v273_v28 }
 0x12f   : > { %461 = vpow2.f32 %v274_v29 }
 0x135   : > { %v462_v30 = vpop.eup %461 }
 0x136   : > { %v276_v31 = vadd.f32 1.0, %v462_v30 }
 0x138   : > { %463 = vrcp.f32 %v276_v31  ;;  %v288_v35 = vand.u32 2147483648, %v276_v31  ;;  %v286_v37 = vand.u32 2147483647, %v276_v31  ;;  %vm282_vm3 = vweird.f32 %v276_v31 }
 0x13a   : > { %v289_v39 = vor.u32 1.1754944e-38, %v288_v35  ;;  %vm287_vm5 = vcmp.eq.f32.partialorder %v286_v37, 8.507059e+37 }
 0x13e   : > { %v464_v32 = vpop.eup %463 }
 0x13f   : > { %v278_v33 = vmul.f32 %v464_v32, %v276_v31  ;;  %vm283_vm2 = vweird.f32 %v464_v32 }
 0x140   : > { %vm284_vm4 = vmor %vm282_vm3, %vm283_vm2 }
 0x141   : > { %v279_v34 = vsub.f32 1.0, %v278_v33 }
 0x143   : > { %v280_v36 = vmul.f32 %v464_v32, %v279_v34 }
 0x145   : > { %v281_v38 = vadd.f32 %v464_v32, %v280_v36 }
 0x147   : > { %v285_v40 = vsel %vm284_vm4, %v464_v32, %v281_v38 }
 0x148   : > { %v290_v41 = vsel %vm287_vm5, %v289_v39, %v285_v40 }
 0x149   : > { %294 = vperm.xlu1 %459, %v290_v41  }
 0x1bb   : > { %v295_v45 = vpop.permute.xlu1 %294 }
 0x1bc   : > { %v299_v46 = vperm.slane %v295_v45, %v298_v44 }
 0x1be   : > { %v301_v47 = vmul.f32 %v299_v46, %v653_v0 }
 0x1c0   : > { %302 = vst [vmem:[%s232_s11] sm:$0xff] %v301_v47 }
 0x1c1   : > { %522 = shalt.err (!%p519_p8)
}
 0x1c2   : > { %411 = dma.vmem_to_hbm [thread:$0]  (%p634_p5), %s318_s12, 128, %s320_s13, %s304_s14  }
 0x1c3 PF: > { %p423_p9 = scmp.ge.s32.totalorder %s561_s21, 2  ;;  %s331_s30 = sand.u32 1, %s549_s18  }
 0x1c4   : > { %s332_s6 = scalar_lea.sflag [#allocation4], %s331_s30 }
 0x1c5   : > { %p418_p10 = pnand %p423_p9, %p638_p6 }
 0x1c7   : > { %p419_p11 = pneg %p418_p10 }
 0x1c9   : > { %544 = dma.done.wait (%p419_p11), %s332_s6, 128  }
 0x1ca   : > { %546 = vsyncadd (%p419_p11), %s332_s6, 4294967168  ;;  %p16_p12 = scmp.ge.s32.totalorder %s621_s24, 4   ;;  %s706_s18 = smov %s553_s19 }
 0x1cb   : > { %s707_s19 = smov %s557_s20  ;;  %s708_s20 = smov %s632_s27 }
 0x1cc   : > { %s709_s21 = smov %s621_s24  ;;  %18 = sbr.rel (!%p16_p12) target bundleno = 4 (0x4), region = 80 }
 0x1d1   :  { %338 = vsyncpa [#allocation3], 1 }
 0x1d2   :  { %340 = vsyncpa [#allocation3 + $0x1], 1 }
 0x1d3   :  { %341 = vsyncpa [#allocation4], 1 }
 0x1d4   :  { %343 = vsyncpa [#allocation4 + $0x1], 1 }

</bundles_post_ra>
